<compile_context>
chip_gen: v7x
topology: tpu7x:2x2x1
jax: 0.10.0
libtpu: 0.0.40
codegen_flags: <defaults>
</compile_context>

<pallas_src>
from functools import partial

import jax
import jax.numpy as jnp
from jax.experimental import pallas as pl
from jax.experimental.pallas import tpu as pltpu

IGNORE_LABEL = 255.0
LANE = 128
ACC_ROWS = 16  # per-core accumulator rows: [0:8] loss partial sums, [8:16] valid counts


# --------------------------------------------------------------------------------------
# Kernel
# --------------------------------------------------------------------------------------
def _pce_kernel(pred_ref, tgt_ref, acc_ref, *, pos_weight, tm, rows,
                total_steps, steps_per_core, ncores):
    if ncores > 1:
        c = pl.program_id(0)              # core-split axis ("parallel")
        i = pl.program_id(1)              # sequential reduction axis ("arbitrary")
        gstep = c * steps_per_core + i
        is_first = i == 0
    else:
        gstep = pl.program_id(0)
        is_first = gstep == 0

    @pl.when(is_first)
    def _init():
        acc_ref[...] = jnp.zeros_like(acc_ref)

    def accumulate(edge):
        x = pred_ref[...].astype(jnp.float32)
        t = tgt_ref[...].astype(jnp.float32)
        mask = t != IGNORE_LABEL
        if edge:
            # Only the single overhang block pays for the iota + row bound check.
            # Row-only index: no int32 overflow for any realistic input size.
            row = jax.lax.broadcasted_iota(jnp.int32, x.shape, 0) + gstep * tm
            mask = jnp.logical_and(row < rows, mask)

        # BCEWithLogitsLoss(reduction='none', pos_weight=p):
        #   loss = (1 - t) * x + (1 + (p - 1) * t) * softplus(-x)
        # softplus(-x) = max(-x, 0) + log1p(exp(-|x|))   (numerically stable, 2 EUP ops)
        sp = jnp.maximum(-x, 0.0) + jnp.log1p(jnp.exp(-jnp.abs(x)))
        if pos_weight == 1.0:   # trace-time branch: common case saves two VPU ops/elem
            loss = (1.0 - t) * x + sp
        else:
            loss = (1.0 - t) * x + (1.0 + (pos_weight - 1.0) * t) * sp

        # Single select (not a multiply) masks ignored pixels AND kills any inf/NaN
        # coming from garbage in the overhang rows or non-finite ignored predictions.
        vf = mask.astype(jnp.float32)
        lv = jnp.where(mask, loss, 0.0)

        # Sublane/lane-wise partial accumulation: reshape to (tm//8, 8, 128) so the
        # per-step reduction is pure vreg-wise VPU adds (no cross-lane XLU reduce).
        acc_ref[0:8, :] += jnp.sum(lv.reshape(tm // 8, 8, LANE), axis=0)
        acc_ref[8:16, :] += jnp.sum(vf.reshape(tm // 8, 8, LANE), axis=0)

    has_overhang = (rows % tm) != 0                      # trace-time
    has_clamped = ncores * steps_per_core > total_steps  # trace-time
    last = total_steps - 1

    if has_overhang:
        @pl.when(gstep < last)            # interior blocks: no iota, no bound check
        def _interior():
            accumulate(edge=False)

        @pl.when(gstep == last)           # the one partial block (excludes clamped steps)
        def _edge():
            accumulate(edge=True)
    elif has_clamped:
        @pl.when(gstep < total_steps)     # skip clamped duplicate steps entirely
        def _all():
            accumulate(edge=False)
    else:
        accumulate(edge=False)


# --------------------------------------------------------------------------------------
# Wrapper
# --------------------------------------------------------------------------------------
def _sublane_align(dtype):
    # f32 -> 8, bf16/f16 -> 16, (u)int8/fp8 -> 32  (native packing, no relayout).
    return max(8, 32 // jnp.dtype(dtype).itemsize)


def _tpu_kind():
    try:
        d = jax.devices()[0]
        if d.platform != "tpu":
            return ""
        return d.device_kind.lower()
    except Exception:
        return ""


def _num_tensorcores(kind):
    # Megacore chips (2 TCs): v4, v5p, v7x.  Single-TC: v5e, v6e.  Unknown -> 1 (safe).
    if "v5 lite" in kind or "v5e" in kind or "v6" in kind:
        return 1
    if "v4" in kind or "v5p" in kind or "v7" in kind:
        return 2
    return 1


def _bce_sums_jnp(x, t, pos_weight):
    """Tiny pure-jnp (sum, count) for the ragged tail / tiny inputs."""
    x = x.astype(jnp.float32)
    t = t.astype(jnp.float32)
    mask = t != IGNORE_LABEL
    sp = jnp.maximum(-x, 0.0) + jnp.log1p(jnp.exp(-jnp.abs(x)))
    w = 1.0 + (float(pos_weight) - 1.0) * t
    loss = (1.0 - t) * x + w * sp
    return jnp.sum(jnp.where(mask, loss, 0.0)), jnp.sum(mask.astype(jnp.float32))


def pce_loss(prediction, target, pos_weight=1.0, tm=None, ncores=None):
    """Pallas implementation of pCELoss.forward (scalar result)."""
    pred = prediction.reshape(-1)
    tgt = target.reshape(-1)
    n = pred.shape[0]

    kind = _tpu_kind()
    if ncores is None:
        ncores = _num_tensorcores(kind)
    if tm is None:
        # v5e: larger blocks help amortize the ~0.35us/step overhead on the lowest-BW chip.
        tm = 4096 if ("v5e" in kind or "v5 lite" in kind) else 2048

    align = max(_sublane_align(pred.dtype), _sublane_align(tgt.dtype))

    rem = n % LANE
    main = n - rem
    rows = main // LANE
    tm_cap = (rows // align) * align     # largest aligned tile that fits inside `rows`

    loss_sum = jnp.zeros((), jnp.float32)
    valid_cnt = jnp.zeros((), jnp.float32)

    if tm_cap == 0:
        # Tiny input: not worth a kernel launch.
        ls, vc = _bce_sums_jnp(pred, tgt, pos_weight)
        return ls / vc

    if rem:
        # <128-element ragged tail: tiny jnp reduction in the wrapper, so the kernel only
        # ever sees a lane-aligned 2D view and needs no per-lane mask.
        # TODO(synk): the prefix slice below may still materialize a copy in XLA for
        # ragged inputs; a fully zero-copy path would need memory_space=pl.ANY + manual DMA.
        ls, vc = _bce_sums_jnp(pred[main:], tgt[main:], pos_weight)
        loss_sum += ls
        valid_cnt += vc
        pred2 = pred[:main].reshape(rows, LANE)
        tgt2 = tgt[:main].reshape(rows, LANE)
    else:
        pred2 = pred.reshape(rows, LANE)   # zero-copy reshape view (common case)
        tgt2 = tgt.reshape(rows, LANE)

    tm = max(align, (int(tm) // align) * align)
    tm = min(tm, tm_cap)                    # never let the block exceed the array rows

    total_steps = pl.cdiv(rows, tm)
    if ncores > 1 and total_steps < 2:
        ncores = 1                          # nothing to split
    steps_per_core = pl.cdiv(total_steps, ncores)

    kern = partial(_pce_kernel, pos_weight=float(pos_weight), tm=tm, rows=rows,
                   total_steps=total_steps, steps_per_core=steps_per_core, ncores=ncores)

    bytes_in = rows * LANE * (jnp.dtype(pred.dtype).itemsize + jnp.dtype(tgt.dtype).itemsize)
    cost = pl.CostEstimate(
        flops=20 * rows * LANE,
        transcendentals=2 * rows * LANE,
        bytes_accessed=bytes_in + ncores * ACC_ROWS * LANE * 4,
    )

    if ncores > 1:
        grid = (ncores, steps_per_core)

        def in_map(c, i):
            # Clamp so the DMA never targets a block fully past the array; the clamped
            # step itself is skipped in-kernel with pl.when (no double counting).
            return (jnp.minimum(c * steps_per_core + i, total_steps - 1), 0)

        out_map = lambda c, i: (c, 0)
        # TODO(synk): on v7x verify "parallel" actually shards across the 2 TCs; if not,
        # switch to (pltpu.CORE_PARALLEL, pltpu.ARBITRARY).
        dims = ("parallel", "arbitrary")
    else:
        grid = (total_steps,)
        in_map = lambda i: (i, 0)
        out_map = lambda i: (0, 0)
        dims = ("arbitrary",)

    acc = pl.pallas_call(
        kern,
        out_shape=jax.ShapeDtypeStruct((ncores * ACC_ROWS, LANE), jnp.float32),
        grid=grid,
        in_specs=[
            pl.BlockSpec((tm, LANE), in_map),
            pl.BlockSpec((tm, LANE), in_map),
        ],
        out_specs=pl.BlockSpec((ACC_ROWS, LANE), out_map),
        compiler_params=pltpu.CompilerParams(
            dimension_semantics=dims,
            vmem_limit_bytes=32 * 1024 * 1024,
        ),
        cost_estimate=cost,
    )(pred2, tgt2)

    acc = acc.reshape(ncores, 2, 8, LANE)
    loss_sum = loss_sum + jnp.sum(acc[:, 0])
    valid_cnt = valid_cnt + jnp.sum(acc[:, 1])
    # Both PyTorch branches collapse to sum/count: with nothing ignored, count == N so
    # sum/count == mean.  All-ignored input gives 0/0 = NaN, same as torch.
    return loss_sum / valid_cnt


# --------------------------------------------------------------------------------------
# Pure-JAX reference mirroring the PyTorch module, for verification.
# --------------------------------------------------------------------------------------
def _reference_loss(prediction, target, pos_weight=1.0):
    x = prediction.astype(jnp.float32)
    t = target.astype(jnp.float32)
    w = 1.0 + (float(pos_weight) - 1.0) * t
    sp = jnp.maximum(-x, 0.0) + jnp.log1p(jnp.exp(-jnp.abs(x)))
    loss = (1.0 - t) * x + w * sp
    valid = (t != IGNORE_LABEL).astype(jnp.float32)
    masked_mean = jnp.sum(loss * valid) / jnp.sum(valid)
    plain_mean = jnp.mean(loss)
    return jnp.where(jnp.sum(1.0 - valid) > 0, masked_mean, plain_mean)


if __name__ == "__main__":
    key = jax.random.PRNGKey(0)
    ks = jax.random.split(key, 9)

    # Test 1: NCHW f32 like the PyTorch module, ~20% ignore labels (masked-mean branch).
    N, C, H, W = 2, 4, 16, 16
    pred1 = jax.random.normal(ks[0], (N, C, H, W), dtype=jnp.float32)
    tgt1 = jax.random.bernoulli(ks[1], 0.5, (N, C, H, W)).astype(jnp.float32)
    ign1 = jax.random.bernoulli(ks[2], 0.2, (N, C, H, W))
    tgt1 = jnp.where(ign1, IGNORE_LABEL, tgt1)
    out1 = jax.block_until_ready(pce_loss(pred1, tgt1, pos_weight=1.0))
    ref1 = _reference_loss(pred1, tgt1, pos_weight=1.0)
    assert jnp.allclose(out1, ref1, rtol=1e-5, atol=1e-6), (out1, ref1)

    # Test 2: ragged numel (% 128 != 0), pos_weight != 1, no ignore labels
    # (exercises the wrapper tail path, the row-overhang edge block and the mean branch).
    shp2 = (3, 5, 7, 11)
    pred2_ = jax.random.normal(ks[3], shp2, dtype=jnp.float32)
    tgt2_ = jax.random.bernoulli(ks[4], 0.5, shp2).astype(jnp.float32)
    out2 = jax.block_until_ready(pce_loss(pred2_, tgt2_, pos_weight=2.0))
    ref2 = _reference_loss(pred2_, tgt2_, pos_weight=2.0)
    assert jnp.allclose(out2, ref2, rtol=1e-5, atol=1e-6), (out2, ref2)

    # Test 3: narrow dtypes straight through the kernel (bf16 preds + bf16 targets).
    pred3 = jax.random.normal(ks[5], (N, C, H, W), dtype=jnp.float32).astype(jnp.bfloat16)
    tgt3 = tgt1.astype(jnp.bfloat16)   # 0.0 / 1.0 / 255.0 are exact in bf16
    out3 = jax.block_until_ready(pce_loss(pred3, tgt3, pos_weight=1.0))
    ref3 = _reference_loss(pred3, tgt3, pos_weight=1.0)
    assert jnp.allclose(out3, ref3, rtol=1e-5, atol=1e-6), (out3, ref3)

    # Test 4: larger input with a forced 2-core split + small tile, so the multi-step
    # grid, interior/edge pl.when gating and the clamped-step skip all get compiled and
    # checked regardless of which TPU generation this runs on.
    shp4 = (1, 2, 288, 144)   # 82944 elems -> rows=648, tm=256 -> 3 steps, 1 clamped
    pred4 = jax.random.normal(ks[6], shp4, dtype=jnp.float32)
    tgt4 = jax.random.bernoulli(ks[7], 0.5, shp4).astype(jnp.float32)
    ign4 = jax.random.bernoulli(ks[8], 0.1, shp4)
    tgt4 = jnp.where(ign4, IGNORE_LABEL, tgt4)
    out4 = jax.block_until_ready(pce_loss(pred4, tgt4, pos_weight=1.5, tm=256, ncores=2))
    ref4 = _reference_loss(pred4, tgt4, pos_weight=1.5)
    assert jnp.allclose(out4, ref4, rtol=1e-5, atol=1e-5), (out4, ref4)

    print("KERNEL_OK")
</pallas_src>

<mosaic_0001>
module attributes {stable_mosaic.version = 11 : i64} {
  func.func @_pce_kernel(%arg0: i32, %arg1: memref<16x128xf32, #tpu.memory_space<vmem>>, %arg2: memref<16x128xf32, #tpu.memory_space<vmem>>, %arg3: memref<16x128xf32, #tpu.memory_space<vmem>>) attributes {dimension_semantics = [#tpu.dimension_semantics<arbitrary>], iteration_bounds = array<i64: 1>, scalar_prefetch = 0 : i64, scratch_operands = 0 : i64, tpu.core_type = #tpu.core_type<tc>, window_params = [{transform_indices = @transform_0, window_bounds = array<i64: 16, 128>}, {transform_indices = @transform_1, window_bounds = array<i64: 16, 128>}, {pipeline_mode = #tpu.pipeline_mode<synchronous>, transform_indices = @transform_2, window_bounds = array<i64: 16, 128>}]} {
    %c0_i32 = arith.constant 0 : i32
    %0 = arith.cmpi eq, %arg0, %c0_i32 : i32
    %1 = arith.extui %0 : i1 to i32
    %c0_i32_0 = arith.constant 0 : i32
    %2 = arith.cmpi ne, %1, %c0_i32_0 : i32
    scf.if %2 {
      %cst_18 = arith.constant 0.000000e+00 : f32
      %35 = vector.broadcast %cst_18 : f32 to vector<16x128xf32>
      %c0_19 = arith.constant 0 : index
      %c0_20 = arith.constant 0 : index
      %36 = vector.load %arg3[%c0_19, %c0_20] : memref<16x128xf32, #tpu.memory_space<vmem>>, vector<16x128xf32>
      tpu.vector_store %arg3[%c0_19, %c0_20], %35 {strides = array<i32>} : memref<16x128xf32, #tpu.memory_space<vmem>>, vector<16x128xf32>,
    } else {
    }
    %c0 = arith.constant 0 : index
    %c0_1 = arith.constant 0 : index
    %3 = vector.load %arg1[%c0, %c0_1] : memref<16x128xf32, #tpu.memory_space<vmem>>, vector<16x128xf32>
    %c0_2 = arith.constant 0 : index
    %c0_3 = arith.constant 0 : index
    %4 = vector.load %arg2[%c0_2, %c0_3] : memref<16x128xf32, #tpu.memory_space<vmem>>, vector<16x128xf32>
    %cst = arith.constant 2.550000e+02 : f32
    %5 = vector.broadcast %cst : f32 to vector<16x128xf32>
    %6 = arith.cmpf one, %4, %5 : vector<16x128xf32>
    %cst_4 = arith.constant 0.000000e+00 : f32
    %7 = vector.broadcast %cst_4 : f32 to vector<16x128xf32>
    %8 = arith.subf %7, %3 : vector<16x128xf32>
    %cst_5 = arith.constant 0.000000e+00 : f32
    %9 = vector.broadcast %cst_5 : f32 to vector<16x128xf32>
    %10 = arith.maximumf %8, %9 : vector<16x128xf32>
    %11 = math.absf %3 : vector<16x128xf32>
    %cst_6 = arith.constant 0.000000e+00 : f32
    %12 = vector.broadcast %cst_6 : f32 to vector<16x128xf32>
    %13 = arith.subf %12, %11 : vector<16x128xf32>
    %14 = math.exp %13 : vector<16x128xf32>
    %15 = math.log1p %14 : vector<16x128xf32>
    %16 = arith.addf %10, %15 : vector<16x128xf32>
    %cst_7 = arith.constant 1.000000e+00 : f32
    %17 = vector.broadcast %cst_7 : f32 to vector<16x128xf32>
    %18 = arith.subf %17, %4 : vector<16x128xf32>
    %19 = arith.mulf %18, %3 : vector<16x128xf32>
    %20 = arith.addf %19, %16 : vector<16x128xf32>
    %21 = arith.extui %6 : vector<16x128xi1> to vector<16x128xi32>
    %22 = arith.sitofp %21 : vector<16x128xi32> to vector<16x128xf32>
    %cst_8 = arith.constant 0.000000e+00 : f32
    %23 = vector.broadcast %cst_8 : f32 to vector<16x128xf32>
    %24 = arith.select %6, %20, %23 : vector<16x128xi1>, vector<16x128xf32>
    %c0_9 = arith.constant 0 : index
    %c0_10 = arith.constant 0 : index
    %25 = vector.load %arg3[%c0_9, %c0_10] : memref<16x128xf32, #tpu.memory_space<vmem>>, vector<8x128xf32>
    %26 = vector.shape_cast %24 : vector<16x128xf32> to vector<2x8x128xf32>
    %cst_11 = arith.constant dense<0.000000e+00> : vector<8x128xf32>
    %27 = vector.multi_reduction <add>, %26, %cst_11 [0] : vector<2x8x128xf32> to vector<8x128xf32>
    %28 = arith.addf %25, %27 : vector<8x128xf32>
    %c0_12 = arith.constant 0 : index
    %c0_13 = arith.constant 0 : index
    %29 = vector.load %arg3[%c0_12, %c0_13] : memref<16x128xf32, #tpu.memory_space<vmem>>, vector<8x128xf32>
    tpu.vector_store %arg3[%c0_12, %c0_13], %28 {strides = array<i32>} : memref<16x128xf32, #tpu.memory_space<vmem>>, vector<8x128xf32>,
    %c8 = arith.constant 8 : index
    %c0_14 = arith.constant 0 : index
    %30 = vector.load %arg3[%c8, %c0_14] : memref<16x128xf32, #tpu.memory_space<vmem>>, vector<8x128xf32>
    %31 = vector.shape_cast %22 : vector<16x128xf32> to vector<2x8x128xf32>
    %cst_15 = arith.constant dense<0.000000e+00> : vector<8x128xf32>
    %32 = vector.multi_reduction <add>, %31, %cst_15 [0] : vector<2x8x128xf32> to vector<8x128xf32>
    %33 = arith.addf %30, %32 : vector<8x128xf32>
    %c8_16 = arith.constant 8 : index
    %c0_17 = arith.constant 0 : index
    %34 = vector.load %arg3[%c8_16, %c0_17] : memref<16x128xf32, #tpu.memory_space<vmem>>, vector<8x128xf32>
    tpu.vector_store %arg3[%c8_16, %c0_17], %33 {strides = array<i32>} : memref<16x128xf32, #tpu.memory_space<vmem>>, vector<8x128xf32>,
    return
  }
  func.func @transform_0(%arg0: i32) -> (i32, i32) {
    %c0_i32 = arith.constant 0 : i32
    %c0_i32_0 = arith.constant 0 : i32
    return %arg0, %c0_i32 : i32, i32
  }
  func.func @transform_1(%arg0: i32) -> (i32, i32) {
    %c0_i32 = arith.constant 0 : i32
    %c0_i32_0 = arith.constant 0 : i32
    return %arg0, %c0_i32 : i32, i32
  }
  func.func @transform_2(%arg0: i32) -> (i32, i32) {
    %c0_i32 = arith.constant 0 : i32
    %c0_i32_0 = arith.constant 0 : i32
    %c0_i32_1 = arith.constant 0 : i32
    return %c0_i32, %c0_i32_0 : i32, i32
  }
}

</mosaic_0001>

<bundles_post_ra>
// kernel: tpu_custom_call.1
= control target key start
LH: loop header
LB: loop body
LE: loop exit
PB: predicated region body
PF: predicated region fallthrough
CT: control target
= control target key end

     0   :  { %7 = vsyncpa [#allocation3], 0  ;;  %s280_s0 = inlined_call_operand.hbm [shape: f32[16,128], index: 0, kind: input, shape index: {}]   ;;  %s281_s1 = inlined_call_operand.hbm [shape: f32[16,128], index: 1, kind: input, shape index: {}]   ;;  %s282_s2 = inlined_call_operand.hbm [shape: f32[16,128], index: 2, kind: output, shape index: {}]  }
   0x1   :  { %8 = vsyncpa [#allocation6], 0 }
   0x2   :  { %9 = vsyncpa [#allocation4], 0  ;;  %s210_s9 = smov [#allocation2]   ;;  %s138_s13 = scalar_lea.hbm %s280_s0, 256 }
   0x3   :  { %s15_s10 = sshll.u32 %s210_s9, 4  ;;  %p139_p0 = scmp.ne.s32.totalorder %s280_s0, %s138_s13  ;;  %s16_s10 = int_to_ptr.vmem [resolvable:$true] %s15_s10 }
   0x4   :  { %p142_p1 = scmp.lt.u32.totalorder %s138_s13, %s280_s0 }
   0x6   :  { %p144_p2 = pnand %p142_p1, %p139_p0 }
   0x8   :  { %147 = shalt.err (!%p144_p2)
}
   0x9   :  { %s148_s18 = scalar_lea.vmem %s16_s10, 256  ;;  %p153_p4 = scmp.lt.s32.totalorder %s16_s10, %s16_s10 }
   0xa   :  { %p149_p3 = scmp.ne.s32.totalorder %s16_s10, %s148_s18  ;;  %p154_p5 = scmp.lt.s32.totalorder %s148_s18, %s148_s18 }
   0xc   :  { %p155_p6 = por %p154_p5, %p153_p4 }
   0xe   :  { %p156_p7 = pnand %p155_p6, %p149_p3 }
  0x10   :  { %159 = shalt.err (!%p156_p7)
}
  0x11   :  { %s211_s19 = smov 128   ;;  %s212_s20 = smov 8  }
  0x12   :  { %21 = dma.hbm_to_vmem [thread:$0]  %s280_s0, 256, %s16_s10, [#allocation3], %s211_s19, %s211_s19, %s212_s20  }
  0x13   :  { %s213_s23 = smov [#allocation5]   ;;  %s160_s27 = scalar_lea.hbm %s281_s1, 256 }
  0x14   :  { %s27_s24 = sshll.u32 %s213_s23, 4  ;;  %p161_p8 = scmp.ne.s32.totalorder %s281_s1, %s160_s27  ;;  %s28_s24 = int_to_ptr.vmem [resolvable:$true] %s27_s24 }
  0x15   :  { %p164_p9 = scmp.lt.u32.totalorder %s160_s27, %s281_s1 }
  0x17   :  { %p166_p10 = pnand %p164_p9, %p161_p8 }
  0x19   :  { %169 = shalt.err (!%p166_p10)
}
  0x1a   :  { %s170_s4 = scalar_lea.vmem %s28_s24, 256  ;;  %p175_p12 = scmp.lt.s32.totalorder %s28_s24, %s28_s24 }
  0x1b   :  { %p171_p11 = scmp.ne.s32.totalorder %s28_s24, %s170_s4  ;;  %p176_p13 = scmp.lt.s32.totalorder %s170_s4, %s170_s4 }
  0x1d   :  { %p177_p0 = por %p176_p13, %p175_p12 }
  0x1f   :  { %p178_p1 = pnand %p177_p0, %p171_p11 }
  0x21   :  { %181 = shalt.err (!%p178_p1)
}
  0x22   :  { %33 = dma.hbm_to_vmem [thread:$0]  %s281_s1, 256, %s28_s24, [#allocation6], %s211_s19, %s211_s19, %s212_s20  }
  0x23   :  { %204 = dma.done.wait [#allocation3], 256  }
  0x24   :  { %205 = vsyncadd [#allocation3], 4294967040 }
  0x25   :  { %206 = dma.done.wait [#allocation6], 256  }
  0x26   :  { %207 = vsyncadd [#allocation6], 4294967040  ;;  %v46_v0 = vld [vmem:[#allocation2] sm:$0xff]  ;;  %v47_v1 = vld [vmem:[#allocation2 + $0x8] sm:$0xff]  ;;  %v214_v7 = vmov 0.0   ;;  %s215_s1 = smov [#allocation7]  }
  0x27   :  { %v48_v2 = vld [vmem:[#allocation5] sm:$0xff]  ;;  %v49_v3 = vld [vmem:[#allocation5 + $0x8] sm:$0xff]  ;;  %v56_v4 = vand.u32 2147483647, %v46_v0  ;;  %v57_v5 = vand.u32 2147483647, %v47_v1 }
  0x28   :  { %vm50_vm0 = vcmp.ne.f32.partialorder %v48_v2, 255.0  ;;  %vm51_vm1 = vcmp.ne.f32.partialorder %v49_v3, 255.0  ;;  %v52_v21 = vsub.f32 0.0, %v46_v0  ;;  %v53_v24 = vsub.f32 0.0, %v47_v1  ;;  %s109_s6 = sshll.u32 %s215_s1, 4  ;;  %s110_s6 = int_to_ptr.vmem [resolvable:$true] %s109_s6 }
  0x29   :  { %v58_v6 = vsub.f32 0.0, %v56_v4  ;;  %v122_v8 = vsel %vm50_vm0, 1.0, %v214_v7  ;;  %v59_v9 = vsub.f32 0.0, %v57_v5  ;;  %v123_v10 = vsel %vm51_vm1, 1.0, %v214_v7  ;;  %s182_s7 = scalar_lea.vmem %s110_s6, 256  ;;  %p187_p3 = scmp.lt.s32.totalorder %s110_s6, %s110_s6 }
  0x2a   :  { %v101_v12 = vadd.f32 %v123_v10, %v122_v8  ;;  %v84_v26 = vsub.f32 1.0, %v48_v2  ;;  %v85_v28 = vsub.f32 1.0, %v49_v3  ;;  %v54_v30 = vmax.f32 %v52_v21, 0.0  ;;  %p183_p2 = scmp.ne.s32.totalorder %s110_s6, %s182_s7  ;;  %p188_p4 = scmp.lt.s32.totalorder %s182_s7, %s182_s7 }
  0x2b   :  { %v60_v11 = vmul.f32 1.442695, %v58_v6  ;;  %v62_v13 = vmul.f32 1.442695, %v59_v9  ;;  %v55_v33 = vmax.f32 %v53_v24, 0.0 }
  0x2c   :  { %103 = vst [vmem:[#allocation7 + $0x8] sm:$0xff] %v101_v12  ;;  %v86_v36 = vmul.f32 %v84_v26, %v46_v0  ;;  %v87_v38 = vmul.f32 %v85_v28, %v47_v1  ;;  %p189_p5 = por %p188_p4, %p187_p3 }
  0x2d   :  { %130 = vpow2.f32 %v60_v11 }
  0x2e   :  { %132 = vpow2.f32 %v62_v13  ;;  %p190_p6 = pnand %p189_p5, %p183_p2 }
  0x37   :  { %v131_v14 = vpop.eup %130 }
  0x38   :  { %v133_v15 = vpop.eup %132  ;;  %v64_v16 = vadd.f32 1.0, %v131_v14  ;;  %v67_v18 = vmul.f32 -0.5, %v131_v14  ;;  %v70_v22 = vand.u32 2147483647, %v131_v14 }
  0x39   :  { %v73_v17 = vadd.f32 1.0, %v133_v15  ;;  %v76_v19 = vmul.f32 -0.5, %v133_v15  ;;  %v79_v25 = vand.u32 2147483647, %v133_v15 }
  0x3a   :  { %134 = vlog2.f32 %v64_v16  ;;  %v68_v20 = vadd.f32 1.0, %v67_v18  ;;  %vm71_vm2 = vcmp.lt.f32.partialorder %v70_v22, 0.0004427343 }
  0x3b   :  { %136 = vlog2.f32 %v73_v17  ;;  %v77_v23 = vadd.f32 1.0, %v76_v19  ;;  %vm80_vm3 = vcmp.lt.f32.partialorder %v79_v25, 0.0004427343 }
  0x3c   :  { %v69_v27 = vmul.f32 %v131_v14, %v68_v20 }
  0x3d   :  { %v78_v31 = vmul.f32 %v133_v15, %v77_v23 }
  0x44   :  { %v135_v29 = vpop.eup %134 }
  0x45   :  { %v137_v32 = vpop.eup %136  ;;  %v66_v34 = vmul.f32 0.6931472, %v135_v29 }
  0x46   :  { %v75_v35 = vmul.f32 0.6931472, %v137_v32 }
  0x47   :  { %v72_v37 = vsel %vm71_vm2, %v69_v27, %v66_v34 }
  0x48   :  { %v81_v39 = vsel %vm80_vm3, %v78_v31, %v75_v35  ;;  %v82_v40 = vadd.f32 %v72_v37, %v54_v30 }
  0x49   :  { %v83_v41 = vadd.f32 %v81_v39, %v55_v33 }
  0x4a   :  { %v88_v42 = vadd.f32 %v86_v36, %v82_v40 }
  0x4b   :  { %v89_v43 = vadd.f32 %v87_v38, %v83_v41 }
  0x4c   :  { %v94_v44 = vsel %vm50_vm0, %v88_v42, 0.0 }
  0x4d   :  { %v95_v45 = vsel %vm51_vm1, %v89_v43, 0.0 }
  0x4e   :  { %v97_v46 = vadd.f32 %v95_v45, %v94_v44 }
  0x50   :  { %99 = vst [vmem:[#allocation7] sm:$0xff] %v97_v46 }
  0x51   :  { %193 = shalt.err (!%p190_p6)
}
  0x52   :  { %s194_s10 = scalar_lea.hbm %s282_s2, 256 }
  0x53   :  { %p195_p7 = scmp.ne.s32.totalorder %s282_s2, %s194_s10  ;;  %p198_p8 = scmp.lt.u32.totalorder %s194_s10, %s282_s2 }
  0x55   :  { %p200_p9 = pnand %p198_p8, %p195_p7 }
  0x57   :  { %203 = shalt.err (!%p200_p9)
}
  0x58   :  { %115 = dma.vmem_to_hbm [thread:$0]  %s110_s6, 256, %s282_s2, [#allocation4], %s211_s19, %s211_s19, %s212_s20  }
  0x59   :  { %208 = dma.done.wait [#allocation4], 256  }
  0x5a   :  { %209 = vsyncadd [#allocation4], 4294967040 }
  0x5b   :  { %119 = vsyncpa [#allocation3], 1 }
  0x5c   :  { %120 = vsyncpa [#allocation6], 1 }
  0x5d   :  { %121 = vsyncpa [#allocation4], 1 }

</bundles_post_ra>
